<compile_context>
chip_gen: v5e
topology: v5e:2x2
jax: 0.10.0
libtpu: 0.0.40
codegen_flags: <defaults>
</compile_context>

<pallas_src>
import functools
import math

import jax
import jax.numpy as jnp
from jax import lax
from jax.experimental import pallas as pl
from jax.experimental.pallas import tpu as pltpu


def _round_up(a, b):
    return (a + b - 1) // b * b


def _vmem_capacity_bytes():
    """Physical VMEM per TensorCore; falls back to the smallest (v7x, 64 MiB) capacity."""
    try:
        info = pltpu.get_tpu_info()
        cap = getattr(info, "vmem_capacity_bytes", None)
        if cap:
            return int(cap)
    except Exception:
        pass
    return 64 * 1024 * 1024


def _vmem_budget_bytes(tm, tv, H, Vp):
    return (2 * tm * Vp * 2        # bf16 logits slab (double-buffered output)
            + 2 * H * tv * 2       # decoder W^T tiles [H, tv] bf16 (double-buffered)
            + 2 * 8 * tv * 4       # decoder bias tiles
            + 2 * tm * H * 2       # x row tiles (bf16)
            + 2 * H * H * 2        # dense W^T (bf16)
            + 6 * 8 * H * 4        # dense bias + LN gamma/beta
            + tm * H * 2           # post-LN hidden scratch (bf16)
            + 2 * tm * 128 * 4     # running max / sum-exp scratch (lane-padded)
            + tm * tv * 4)         # in-flight f32 logits tile / finalize temporary


def _mlm_head_kernel(x_ref, w_ref, b_ref, g_ref, beta_ref,
                     dec_w_ref, dec_b_ref, out_ref, h_ref, m_ref, l_ref, *, tv):
    j = pl.program_id(1)

    # ---- BertPredictionHeadTransform: dense(H->H) + gelu + LayerNorm, once per row tile ----
    @pl.when(j == 0)
    def _():
        h = jnp.dot(x_ref[...], w_ref[...],
                    preferred_element_type=jnp.float32) + b_ref[...]
        # exact gelu (erf form), matching original BERT gelu
        h = 0.5 * h * (1.0 + lax.erf(h * jnp.float32(1.0 / math.sqrt(2.0))))
        mean = jnp.mean(h, axis=-1, keepdims=True)
        var = jnp.mean((h - mean) * (h - mean), axis=-1, keepdims=True)
        h = (h - mean) * lax.rsqrt(var + 1e-12)
        h = h * g_ref[...] + beta_ref[...]
        # NOTE: hidden kept in bf16 for the decoder matmul (adds rounding vs f32 reference).
        h_ref[...] = h.astype(h_ref.dtype)
        m_ref[...] = jnp.full_like(m_ref, -jnp.inf)
        l_ref[...] = jnp.zeros_like(l_ref)

    # ---- decoder slice: NN-form matmul h[tm,H] @ dec_w^T[H,tv] (pre-transposed in HBM) ----
    logits = jnp.dot(h_ref[...], dec_w_ref[...],
                     preferred_element_type=jnp.float32) + dec_b_ref[...]

    # ---- online log-softmax statistics (flash-style, f32 on the EUP/VPU slack) ----
    tile_max = jnp.max(logits, axis=-1, keepdims=True)
    m_new = jnp.maximum(m_ref[...], tile_max)
    alpha = jnp.exp(m_ref[...] - m_new)
    l_ref[...] = alpha * l_ref[...] + jnp.sum(jnp.exp(logits - m_new),
                                              axis=-1, keepdims=True)
    m_ref[...] = m_new

    col = pl.multiple_of(j * tv, 128)
    out_ref[:, pl.ds(col, tv)] = logits.astype(out_ref.dtype)

    # ---- finalize: subtract lse from the resident slab in tv-wide chunks (no exp pass,
    #      bounded f32 temporaries) ----
    @pl.when(j == pl.num_programs(1) - 1)
    def _():
        lse = m_ref[...] + jnp.log(l_ref[...])
        n_chunks = out_ref.shape[1] // tv

        def body(t, carry):
            c = pl.multiple_of(t * tv, 128)
            blk = out_ref[:, pl.ds(c, tv)].astype(jnp.float32)
            out_ref[:, pl.ds(c, tv)] = (blk - lse).astype(out_ref.dtype)
            return carry

        lax.fori_loop(0, n_chunks, body, 0)


def bert_only_mlm_head(sequence_output, params, *, tm=None, tv=2048):
    """sequence_output: [B, S, H] -> log-softmax prediction scores [B, S, V] (bf16)."""
    B, S, H = sequence_output.shape
    V = params["decoder_w"].shape[0]
    M = B * S

    tv_eff = min(tv, _round_up(V, 128))
    Vp = _round_up(V, tv_eff)

    # Generation-aware VMEM cap: ~80% of physical (v7x 64MiB -> ~51MiB; v5e/v6e 128 -> ~102MiB).
    vmem_cap = _vmem_capacity_bytes()
    vmem_limit = int(vmem_cap * 0.8)
    headroom = 4 * 1024 * 1024

    if tm is None:
        # Largest row tile that fits: cuts the dominant dec_w HBM re-stream by Mp/tm.
        # Multiples of 256 preferred for the v6e/v7x 2x256 MXU.
        tm = 128
        for cand in (1024, 512, 256, 128):
            if _vmem_budget_bytes(cand, tv_eff, H, Vp) + headroom <= vmem_limit:
                tm = cand
                break
    # TODO(synk): on v7x, nudge tm so Mp//tm is even for balanced megacore sharding.

    tm_eff = min(tm, _round_up(M, 8))
    Mp = _round_up(M, tm_eff)

    x = sequence_output.reshape(M, H).astype(jnp.bfloat16)
    if Mp != M:
        x = jnp.pad(x, ((0, Mp - M), (0, 0)))

    # One-time HBM transposes (amortized over every row tile's reuse).
    dense_w_t = params["dense_w"].T.astype(jnp.bfloat16)             # [H, H] (in, out)
    dense_b = params["dense_b"].reshape(1, H).astype(jnp.float32)
    ln_g = params["ln_g"].reshape(1, H).astype(jnp.float32)
    ln_b = params["ln_b"].reshape(1, H).astype(jnp.float32)
    dec_w_t = params["decoder_w"].T.astype(jnp.bfloat16)             # [H, V] tied embeddings
    dec_b = params["decoder_b"].reshape(1, V).astype(jnp.float32)
    if Vp != V:
        dec_w_t = jnp.pad(dec_w_t, ((0, 0), (0, Vp - V)))
        # padded vocab columns get a huge negative bias so they vanish in the online lse
        dec_b = jnp.pad(dec_b, ((0, 0), (0, Vp - V)), constant_values=-1e30)

    grid = (Mp // tm_eff, Vp // tv_eff)

    kernel = functools.partial(_mlm_head_kernel, tv=tv_eff)

    out = pl.pallas_call(
        kernel,
        out_shape=jax.ShapeDtypeStruct((Mp, Vp), jnp.bfloat16),
        grid_spec=pltpu.PrefetchScalarGridSpec(
            num_scalar_prefetch=0,
            grid=grid,
            in_specs=[
                pl.BlockSpec((tm_eff, H), lambda i, j: (i, 0)),      # x row tile
                pl.BlockSpec((H, H), lambda i, j: (0, 0)),           # dense W^T
                pl.BlockSpec((1, H), lambda i, j: (0, 0)),           # dense bias
                pl.BlockSpec((1, H), lambda i, j: (0, 0)),           # LayerNorm gamma
                pl.BlockSpec((1, H), lambda i, j: (0, 0)),           # LayerNorm beta
                pl.BlockSpec((H, tv_eff), lambda i, j: (0, j)),      # decoder W^T tile [H, tv]
                pl.BlockSpec((1, tv_eff), lambda i, j: (0, j)),      # decoder bias tile
            ],
            out_specs=pl.BlockSpec((tm_eff, Vp), lambda i, j: (i, 0)),
            scratch_shapes=[
                pltpu.VMEM((tm_eff, H), jnp.bfloat16),   # post-LN hidden
                pltpu.VMEM((tm_eff, 1), jnp.float32),    # running max
                pltpu.VMEM((tm_eff, 1), jnp.float32),    # running sum-exp
            ],
        ),
        compiler_params=pltpu.CompilerParams(
            dimension_semantics=("parallel", "arbitrary"),
            vmem_limit_bytes=vmem_limit),
    )(x, dense_w_t, dense_b, ln_g, ln_b, dec_w_t, dec_b)

    # TODO(synk): fuse the downstream NLL gather + lse into the kernel so the full [M, V]
    # log-prob matrix never hits HBM; the crop below still materializes one bf16 copy
    # when Vp != V (it is half the traffic of the previous f32 version).
    return out[:M, :V].reshape(B, S, V)


def init_params(key, hidden, vocab):
    k1, k2, k3 = jax.random.split(key, 3)
    return {
        # BertPredictionHeadTransform.dense: Linear(hidden, hidden), weight [out, in]
        "dense_w": jax.random.normal(k1, (hidden, hidden), jnp.float32) * 0.02,
        "dense_b": jnp.zeros((hidden,), jnp.float32),
        # BertLayerNorm(hidden)
        "ln_g": jnp.ones((hidden,), jnp.float32),
        "ln_b": jnp.zeros((hidden,), jnp.float32),
        # decoder weight tied to bert_model_embedding_weights: [vocab, hidden]
        "decoder_w": jax.random.normal(k2, (vocab, hidden), jnp.float32) * 0.02,
        # standalone output bias: [vocab]
        "decoder_b": jax.random.normal(k3, (vocab,), jnp.float32) * 0.02,
    }


def _reference(x, p):
    h = x @ p["dense_w"].T + p["dense_b"]
    h = 0.5 * h * (1.0 + lax.erf(h / jnp.sqrt(2.0)))
    mean = jnp.mean(h, axis=-1, keepdims=True)
    var = jnp.mean((h - mean) ** 2, axis=-1, keepdims=True)
    h = (h - mean) / jnp.sqrt(var + 1e-12) * p["ln_g"] + p["ln_b"]
    logits = h @ p["decoder_w"].T + p["decoder_b"]
    return jax.nn.log_softmax(logits, axis=-1)


if __name__ == "__main__":
    B, S, H, V = 2, 8, 32, 512
    key = jax.random.PRNGKey(0)
    kx, kp = jax.random.split(key)
    sequence_output = jax.random.normal(kx, (B, S, H), jnp.float32)
    params = init_params(kp, H, V)

    out = bert_only_mlm_head(sequence_output, params)
    out = jax.block_until_ready(out)

    ref = _reference(sequence_output, params)
    assert out.shape == (B, S, V)
    # bf16 log-prob output + bf16 matmul operands (f32 accumulation/stats) -> loose tolerance
    assert jnp.allclose(out.astype(jnp.float32), ref, atol=5e-2, rtol=5e-2), \
        "mismatch vs reference"
    print("KERNEL_OK")
</pallas_src>

<mosaic_0001>
module attributes {stable_mosaic.version = 11 : i64} {
  func.func @_mlm_head_kernel(%arg0: i32, %arg1: i32, %arg2: memref<16x32xbf16, #tpu.memory_space<vmem>>, %arg3: memref<32x32xbf16, #tpu.memory_space<vmem>>, %arg4: memref<1x32xf32, #tpu.memory_space<vmem>>, %arg5: memref<1x32xf32, #tpu.memory_space<vmem>>, %arg6: memref<1x32xf32, #tpu.memory_space<vmem>>, %arg7: memref<32x512xbf16, #tpu.memory_space<vmem>>, %arg8: memref<1x512xf32, #tpu.memory_space<vmem>>, %arg9: memref<16x512xbf16, #tpu.memory_space<vmem>>, %arg10: memref<16x32xbf16, #tpu.memory_space<vmem>>, %arg11: memref<16x1xf32, #tpu.memory_space<vmem>>, %arg12: memref<16x1xf32, #tpu.memory_space<vmem>>) attributes {dimension_semantics = [#tpu.dimension_semantics<parallel>, #tpu.dimension_semantics<arbitrary>], iteration_bounds = array<i64: 1, 1>, scalar_prefetch = 0 : i64, scratch_operands = 3 : i64, tpu.core_type = #tpu.core_type<tc>, window_params = [{transform_indices = @transform_0, window_bounds = array<i64: 16, 32>}, {pipeline_mode = #tpu.pipeline_mode<synchronous>, transform_indices = @transform_1, window_bounds = array<i64: 32, 32>}, {pipeline_mode = #tpu.pipeline_mode<synchronous>, transform_indices = @transform_2, window_bounds = array<i64: 1, 32>}, {pipeline_mode = #tpu.pipeline_mode<synchronous>, transform_indices = @transform_3, window_bounds = array<i64: 1, 32>}, {pipeline_mode = #tpu.pipeline_mode<synchronous>, transform_indices = @transform_4, window_bounds = array<i64: 1, 32>}, {transform_indices = @transform_5, window_bounds = array<i64: 32, 512>}, {transform_indices = @transform_6, window_bounds = array<i64: 1, 512>}, {transform_indices = @transform_7, window_bounds = array<i64: 16, 512>}]} {
    %c0_i32 = arith.constant 0 : i32
    %0 = arith.cmpi eq, %arg1, %c0_i32 : i32
    %1 = arith.extui %0 : i1 to i32
    %c0_i32_0 = arith.constant 0 : i32
    %2 = arith.cmpi ne, %1, %c0_i32_0 : i32
    scf.if %2 {
      %c0_21 = arith.constant 0 : index
      %c0_22 = arith.constant 0 : index
      %34 = vector.load %arg2[%c0_21, %c0_22] : memref<16x32xbf16, #tpu.memory_space<vmem>>, vector<16x32xbf16>
      %c0_23 = arith.constant 0 : index
      %c0_24 = arith.constant 0 : index
      %35 = vector.load %arg3[%c0_23, %c0_24] : memref<32x32xbf16, #tpu.memory_space<vmem>>, vector<32x32xbf16>
      %cst_25 = arith.constant dense<0.000000e+00> : vector<16x32xf32>
      %36 = tpu.matmul %34, %35, %cst_25 {dimension_numbers = #tpu.dot_dimension_numbers<[1], [0], [0], [1], [0, 0, 1, 1], [], []>} : vector<16x32xbf16>, vector<32x32xbf16>, vector<16x32xf32> -> vector<16x32xf32>
      %c0_26 = arith.constant 0 : index
      %c0_27 = arith.constant 0 : index
      %37 = vector.load %arg4[%c0_26, %c0_27] : memref<1x32xf32, #tpu.memory_space<vmem>>, vector<1x32xf32>
      %38 = vector.broadcast %37 : vector<1x32xf32> to vector<16x32xf32>
      %39 = arith.addf %36, %38 : vector<16x32xf32>
      %cst_28 = arith.constant 5.000000e-01 : f32
      %40 = vector.broadcast %cst_28 : f32 to vector<16x32xf32>
      %41 = arith.mulf %40, %39 : vector<16x32xf32>
      %cst_29 = arith.constant 0.707106769 : f32
      %42 = vector.broadcast %cst_29 : f32 to vector<16x32xf32>
      %43 = arith.mulf %39, %42 : vector<16x32xf32>
      %44 = math.erf %43 : vector<16x32xf32>
      %cst_30 = arith.constant 1.000000e+00 : f32
      %45 = vector.broadcast %cst_30 : f32 to vector<16x32xf32>
      %46 = arith.addf %45, %44 : vector<16x32xf32>
      %47 = arith.mulf %41, %46 : vector<16x32xf32>
      %cst_31 = arith.constant dense<0.000000e+00> : vector<16xf32>
      %48 = vector.multi_reduction <add>, %47, %cst_31 [1] : vector<16x32xf32> to vector<16xf32>
      %49 = vector.shape_cast %48 : vector<16xf32> to vector<16x1xf32>
      %cst_32 = arith.constant 3.200000e+01 : f32
      %50 = vector.broadcast %cst_32 : f32 to vector<16x1xf32>
      %51 = arith.divf %49, %50 : vector<16x1xf32>
      %52 = vector.broadcast %51 : vector<16x1xf32> to vector<16x32xf32>
      %53 = arith.subf %47, %52 : vector<16x32xf32>
      %54 = vector.broadcast %51 : vector<16x1xf32> to vector<16x32xf32>
      %55 = arith.subf %47, %54 : vector<16x32xf32>
      %56 = arith.mulf %53, %55 : vector<16x32xf32>
      %cst_33 = arith.constant dense<0.000000e+00> : vector<16xf32>
      %57 = vector.multi_reduction <add>, %56, %cst_33 [1] : vector<16x32xf32> to vector<16xf32>
      %58 = vector.shape_cast %57 : vector<16xf32> to vector<16x1xf32>
      %cst_34 = arith.constant 3.200000e+01 : f32
      %59 = vector.broadcast %cst_34 : f32 to vector<16x1xf32>
      %60 = arith.divf %58, %59 : vector<16x1xf32>
      %61 = vector.broadcast %51 : vector<16x1xf32> to vector<16x32xf32>
      %62 = arith.subf %47, %61 : vector<16x32xf32>
      %cst_35 = arith.constant 9.99999996E-13 : f32
      %63 = vector.broadcast %cst_35 : f32 to vector<16x1xf32>
      %64 = arith.addf %60, %63 : vector<16x1xf32>
      %65 = math.rsqrt %64 : vector<16x1xf32>
      %66 = vector.broadcast %65 : vector<16x1xf32> to vector<16x32xf32>
      %67 = arith.mulf %62, %66 : vector<16x32xf32>
      %c0_36 = arith.constant 0 : index
      %c0_37 = arith.constant 0 : index
      %68 = vector.load %arg5[%c0_36, %c0_37] : memref<1x32xf32, #tpu.memory_space<vmem>>, vector<1x32xf32>
      %69 = vector.broadcast %68 : vector<1x32xf32> to vector<16x32xf32>
      %70 = arith.mulf %67, %69 : vector<16x32xf32>
      %c0_38 = arith.constant 0 : index
      %c0_39 = arith.constant 0 : index
      %71 = vector.load %arg6[%c0_38, %c0_39] : memref<1x32xf32, #tpu.memory_space<vmem>>, vector<1x32xf32>
      %72 = vector.broadcast %71 : vector<1x32xf32> to vector<16x32xf32>
      %73 = arith.addf %70, %72 : vector<16x32xf32>
      %74 = arith.truncf %73 : vector<16x32xf32> to vector<16x32xbf16>
      %c0_40 = arith.constant 0 : index
      %c0_41 = arith.constant 0 : index
      %75 = vector.load %arg10[%c0_40, %c0_41] : memref<16x32xbf16, #tpu.memory_space<vmem>>, vector<16x32xbf16>
      tpu.vector_store %arg10[%c0_40, %c0_41], %74 {strides = array<i32>} : memref<16x32xbf16, #tpu.memory_space<vmem>>, vector<16x32xbf16>,
      %cst_42 = arith.constant 0xFF800000 : f32
      %76 = vector.broadcast %cst_42 : f32 to vector<16x1xf32>
      %c0_43 = arith.constant 0 : index
      %c0_44 = arith.constant 0 : index
      %77 = vector.load %arg11[%c0_43, %c0_44] : memref<16x1xf32, #tpu.memory_space<vmem>>, vector<16x1xf32>
      tpu.vector_store %arg11[%c0_43, %c0_44], %76 {strides = array<i32>} : memref<16x1xf32, #tpu.memory_space<vmem>>, vector<16x1xf32>,
      %cst_45 = arith.constant 0.000000e+00 : f32
      %78 = vector.broadcast %cst_45 : f32 to vector<16x1xf32>
      %c0_46 = arith.constant 0 : index
      %c0_47 = arith.constant 0 : index
      %79 = vector.load %arg12[%c0_46, %c0_47] : memref<16x1xf32, #tpu.memory_space<vmem>>, vector<16x1xf32>
      tpu.vector_store %arg12[%c0_46, %c0_47], %78 {strides = array<i32>} : memref<16x1xf32, #tpu.memory_space<vmem>>, vector<16x1xf32>,
    } else {
    }
    %c0 = arith.constant 0 : index
    %c0_1 = arith.constant 0 : index
    %3 = vector.load %arg10[%c0, %c0_1] : memref<16x32xbf16, #tpu.memory_space<vmem>>, vector<16x32xbf16>
    %c0_2 = arith.constant 0 : index
    %c0_3 = arith.constant 0 : index
    %4 = vector.load %arg7[%c0_2, %c0_3] : memref<32x512xbf16, #tpu.memory_space<vmem>>, vector<32x512xbf16>
    %cst = arith.constant dense<0.000000e+00> : vector<16x512xf32>
    %5 = tpu.matmul %3, %4, %cst {dimension_numbers = #tpu.dot_dimension_numbers<[1], [0], [0], [1], [0, 0, 1, 1], [], []>} : vector<16x32xbf16>, vector<32x512xbf16>, vector<16x512xf32> -> vector<16x512xf32>
    %c0_4 = arith.constant 0 : index
    %c0_5 = arith.constant 0 : index
    %6 = vector.load %arg8[%c0_4, %c0_5] : memref<1x512xf32, #tpu.memory_space<vmem>>, vector<1x512xf32>
    %7 = vector.broadcast %6 : vector<1x512xf32> to vector<16x512xf32>
    %8 = arith.addf %5, %7 : vector<16x512xf32>
    %cst_6 = arith.constant dense<0xFF800000> : vector<16xf32>
    %9 = vector.multi_reduction <maximumf>, %8, %cst_6 [1] : vector<16x512xf32> to vector<16xf32>
    %10 = vector.shape_cast %9 : vector<16xf32> to vector<16x1xf32>
    %c0_7 = arith.constant 0 : index
    %c0_8 = arith.constant 0 : index
    %11 = vector.load %arg11[%c0_7, %c0_8] : memref<16x1xf32, #tpu.memory_space<vmem>>, vector<16x1xf32>
    %12 = arith.maximumf %11, %10 : vector<16x1xf32>
    %c0_9 = arith.constant 0 : index
    %c0_10 = arith.constant 0 : index
    %13 = vector.load %arg11[%c0_9, %c0_10] : memref<16x1xf32, #tpu.memory_space<vmem>>, vector<16x1xf32>
    %14 = arith.subf %13, %12 : vector<16x1xf32>
    %15 = math.exp %14 : vector<16x1xf32>
    %c0_11 = arith.constant 0 : index
    %c0_12 = arith.constant 0 : index
    %16 = vector.load %arg12[%c0_11, %c0_12] : memref<16x1xf32, #tpu.memory_space<vmem>>, vector<16x1xf32>
    %17 = arith.mulf %15, %16 : vector<16x1xf32>
    %18 = vector.broadcast %12 : vector<16x1xf32> to vector<16x512xf32>
    %19 = arith.subf %8, %18 : vector<16x512xf32>
    %20 = math.exp %19 : vector<16x512xf32>
    %cst_13 = arith.constant dense<0.000000e+00> : vector<16xf32>
    %21 = vector.multi_reduction <add>, %20, %cst_13 [1] : vector<16x512xf32> to vector<16xf32>
    %22 = vector.shape_cast %21 : vector<16xf32> to vector<16x1xf32>
    %23 = arith.addf %17, %22 : vector<16x1xf32>
    %c0_14 = arith.constant 0 : index
    %c0_15 = arith.constant 0 : index
    %24 = vector.load %arg12[%c0_14, %c0_15] : memref<16x1xf32, #tpu.memory_space<vmem>>, vector<16x1xf32>
    tpu.vector_store %arg12[%c0_14, %c0_15], %23 {strides = array<i32>} : memref<16x1xf32, #tpu.memory_space<vmem>>, vector<16x1xf32>,
    %c0_16 = arith.constant 0 : index
    %c0_17 = arith.constant 0 : index
    %25 = vector.load %arg11[%c0_16, %c0_17] : memref<16x1xf32, #tpu.memory_space<vmem>>, vector<16x1xf32>
    tpu.vector_store %arg11[%c0_16, %c0_17], %12 {strides = array<i32>} : memref<16x1xf32, #tpu.memory_space<vmem>>, vector<16x1xf32>,
    %c512_i32 = arith.constant 512 : i32
    %26 = arith.muli %arg1, %c512_i32 : i32
    %27 = tpu.assume_multiple %26, 128 : i32
    %28 = arith.truncf %8 : vector<16x512xf32> to vector<16x512xbf16>
    %c0_18 = arith.constant 0 : index
    %29 = arith.index_cast %27 : i32 to index
    %30 = vector.load %arg9[%c0_18, %29] : memref<16x512xbf16, #tpu.memory_space<vmem>>, vector<16x512xbf16>
    tpu.vector_store %arg9[%c0_18, %29], %28 {strides = array<i32>} : memref<16x512xbf16, #tpu.memory_space<vmem>>, vector<16x512xbf16>,
    %c0_i32_19 = arith.constant 0 : i32
    %31 = arith.cmpi eq, %arg1, %c0_i32_19 : i32
    %32 = arith.extui %31 : i1 to i32
    %c0_i32_20 = arith.constant 0 : i32
    %33 = arith.cmpi ne, %32, %c0_i32_20 : i32
    scf.if %33 {
      %c0_21 = arith.constant 0 : index
      %c0_22 = arith.constant 0 : index
      %34 = vector.load %arg11[%c0_21, %c0_22] : memref<16x1xf32, #tpu.memory_space<vmem>>, vector<16x1xf32>
      %c0_23 = arith.constant 0 : index
      %c0_24 = arith.constant 0 : index
      %35 = vector.load %arg12[%c0_23, %c0_24] : memref<16x1xf32, #tpu.memory_space<vmem>>, vector<16x1xf32>
      %36 = math.log %35 : vector<16x1xf32>
      %37 = arith.addf %34, %36 : vector<16x1xf32>
      %c0_i32_25 = arith.constant 0 : i32
      %c512_i32_26 = arith.constant 512 : i32
      %38 = arith.muli %c0_i32_25, %c512_i32_26 : i32
      %39 = tpu.assume_multiple %38, 128 : i32
      %c0_27 = arith.constant 0 : index
      %40 = arith.index_cast %39 : i32 to index
      %41 = vector.load %arg9[%c0_27, %40] : memref<16x512xbf16, #tpu.memory_space<vmem>>, vector<16x512xbf16>
      %42 = arith.extf %41 : vector<16x512xbf16> to vector<16x512xf32>
      %43 = vector.broadcast %37 : vector<16x1xf32> to vector<16x512xf32>
      %44 = arith.subf %42, %43 : vector<16x512xf32>
      %45 = arith.truncf %44 : vector<16x512xf32> to vector<16x512xbf16>
      %c0_28 = arith.constant 0 : index
      %46 = arith.index_cast %39 : i32 to index
      %47 = vector.load %arg9[%c0_28, %46] : memref<16x512xbf16, #tpu.memory_space<vmem>>, vector<16x512xbf16>
      tpu.vector_store %arg9[%c0_28, %46], %45 {strides = array<i32>} : memref<16x512xbf16, #tpu.memory_space<vmem>>, vector<16x512xbf16>,
      %c1_i32 = arith.constant 1 : i32
    } else {
    }
    return
  }
  func.func @transform_0(%arg0: i32, %arg1: i32) -> (i32, i32) {
    %c0_i32 = arith.constant 0 : i32
    %c0_i32_0 = arith.constant 0 : i32
    return %arg0, %c0_i32 : i32, i32
  }
  func.func @transform_1(%arg0: i32, %arg1: i32) -> (i32, i32) {
    %c0_i32 = arith.constant 0 : i32
    %c0_i32_0 = arith.constant 0 : i32
    %c0_i32_1 = arith.constant 0 : i32
    return %c0_i32, %c0_i32_0 : i32, i32
  }
  func.func @transform_2(%arg0: i32, %arg1: i32) -> (i32, i32) {
    %c0_i32 = arith.constant 0 : i32
    %c0_i32_0 = arith.constant 0 : i32
    %c0_i32_1 = arith.constant 0 : i32
    return %c0_i32, %c0_i32_0 : i32, i32
  }
  func.func @transform_3(%arg0: i32, %arg1: i32) -> (i32, i32) {
    %c0_i32 = arith.constant 0 : i32
    %c0_i32_0 = arith.constant 0 : i32
    %c0_i32_1 = arith.constant 0 : i32
    return %c0_i32, %c0_i32_0 : i32, i32
  }
  func.func @transform_4(%arg0: i32, %arg1: i32) -> (i32, i32) {
    %c0_i32 = arith.constant 0 : i32
    %c0_i32_0 = arith.constant 0 : i32
    %c0_i32_1 = arith.constant 0 : i32
    return %c0_i32, %c0_i32_0 : i32, i32
  }
  func.func @transform_5(%arg0: i32, %arg1: i32) -> (i32, i32) {
    %c0_i32 = arith.constant 0 : i32
    %c0_i32_0 = arith.constant 0 : i32
    return %c0_i32, %arg1 : i32, i32
  }
  func.func @transform_6(%arg0: i32, %arg1: i32) -> (i32, i32) {
    %c0_i32 = arith.constant 0 : i32
    %c0_i32_0 = arith.constant 0 : i32
    return %c0_i32, %arg1 : i32, i32
  }
  func.func @transform_7(%arg0: i32, %arg1: i32) -> (i32, i32) {
    %c0_i32 = arith.constant 0 : i32
    %c0_i32_0 = arith.constant 0 : i32
    return %arg0, %c0_i32 : i32, i32
  }
}

</mosaic_0001>

<bundles_post_ra>
// kernel: tpu_custom_call.1
= control target key start
LH: loop header
LB: loop body
LE: loop exit
PB: predicated region body
PF: predicated region fallthrough
CT: control target
= control target key end

     0   :  { %12 = vsyncpa [#allocation6], 0  ;;  %s1036_s0 = inlined_call_operand.hbm [shape: bf16[16,32], index: 0, kind: input, shape index: {}]   ;;  %s1037_s1 = inlined_call_operand.hbm [shape: bf16[32,32], index: 1, kind: input, shape index: {}]   ;;  %s1038_s2 = inlined_call_operand.vmem [shape: f32[1,32], index: 2, kind: input, shape index: {}]   ;;  %s1039_s3 = inlined_call_operand.hbm [shape: f32[1,32], index: 3, kind: input, shape index: {}]   ;;  %s1040_s4 = inlined_call_operand.hbm [shape: f32[1,32], index: 4, kind: input, shape index: {}]   ;;  %s1041_s5 = inlined_call_operand.hbm [shape: bf16[32,512], index: 5, kind: input, shape index: {}]   ;;  %s1042_s6 = inlined_call_operand.vmem [shape: f32[1,512], index: 6, kind: input, shape index: {}]   ;;  %s1043_s7 = inlined_call_operand.hbm [shape: bf16[16,512], index: 7, kind: output, shape index: {}]  }
   0x1   :  { %13 = vsyncpa [#allocation9], 0 }
   0x2   :  { %14 = vsyncpa [#allocation12], 0 }
   0x3   :  { %15 = vsyncpa [#allocation7], 0  ;;  %s33_s26 = sshll.u32 %s1037_s1, 4  ;;  %s872_s27 = smov [#allocation8]   ;;  %s34_s26 = int_to_ptr.hbm [resolvable:$true] %s33_s26 }
   0x4   :  { %s35_s28 = sshll.u32 %s872_s27, 4  ;;  %s60_s8 = sshll.u32 %s1040_s4, 4  ;;  %s36_s28 = int_to_ptr.vmem [resolvable:$true] %s35_s28  ;;  %s61_s8 = int_to_ptr.hbm [resolvable:$true] %s60_s8 }
   0x5   :  { %s873_s9 = smov 64   ;;  %s874_s10 = smov 4  }
   0x6   :  { %41 = dma.hbm_to_vmem [thread:$0]  %s34_s26, 256, %s36_s28, [#allocation9], %s873_s9, %s873_s9, %s874_s10  }
   0x7   :  { %s875_s11 = smov [#allocation11]   ;;  %s20_s15 = sshll.u32 %s1036_s0, 4  ;;  %s21_s15 = int_to_ptr.hbm [resolvable:$true] %s20_s15 }
   0x8   :  { %s62_s12 = sshll.u32 %s875_s11, 4  ;;  %s49_s17 = sshll.u32 %s1039_s3, 4  ;;  %s63_s12 = int_to_ptr.vmem [resolvable:$true] %s62_s12  ;;  %s50_s17 = int_to_ptr.hbm [resolvable:$true] %s49_s17 }
   0x9   :  { %65 = dma.hbm_to_vmem [thread:$0]  %s61_s8, 16, %s63_s12, [#allocation12]  }
   0xa   :  { %s876_s18 = smov [#allocation5]   ;;  %s877_s4 = smov [#allocation10]  }
   0xb   :  { %s22_s19 = sshll.u32 %s876_s18, 4  ;;  %s51_s20 = sshll.u32 %s877_s4, 4  ;;  %s23_s19 = int_to_ptr.vmem [resolvable:$true] %s22_s19  ;;  %s52_s20 = int_to_ptr.vmem [resolvable:$true] %s51_s20 }
   0xc   :  { %28 = dma.hbm_to_vmem [thread:$0]  %s21_s15, 128, %s23_s19, [#allocation6], %s873_s9, %s873_s9, %s874_s10  }
   0xd   :  { %s70_s23 = sshll.u32 %s1041_s5, 4  ;;  %s878_s0 = smov [#allocation13]   ;;  %s71_s23 = int_to_ptr.hbm [resolvable:$true] %s70_s23 }
   0xe   :  { %54 = dma.hbm_to_vmem [thread:$0]  %s50_s17, 16, %s52_s20, [#allocation9]  }
   0xf   :  { %s72_s24 = sshll.u32 %s878_s0, 4  ;;  %s879_s25 = smov 256   ;;  %s73_s24 = int_to_ptr.vmem [resolvable:$true] %s72_s24 }
  0x10   :  { %s880_s26 = smov 16  }
  0x11   :  { %78 = dma.hbm_to_vmem [thread:$0]  %s71_s23, 1024, %s73_s24, [#allocation12], %s879_s25, %s879_s25, %s880_s26  }
  0x12   :  { %864 = dma.done.wait [#allocation6], 128  }
  0x13   :  { %865 = vsyncadd [#allocation6], 4294967168 }
  0x14   :  { %866 = dma.done.wait [#allocation9], 272  }
  0x15   :  { %867 = vsyncadd [#allocation9], 4294967024 }
  0x16   :  { %868 = dma.done.wait [#allocation12], 1040  }
  0x17   :  { %869 = vsyncadd [#allocation12], 4294966256  ;;  %v656_v0 = vld [vmem:[#allocation8 + $0x8] sm:$0xff]  ;;  %v655_v1 = vld [vmem:[#allocation8] sm:$0xff]  ;;  %vm133_vm0 = vcmask 261120   ;;  %vm304_vm14 = vcmask 257024  }
  0x18   :  { %143 = vmatpush.bf16.msra.mxu0 %v656_v0  ;;  %v654_v2 = vld [vmem:[#allocation5] sm:$0xff]  ;;  %v683_v3 = vld [vmem:[%s1038_s2] ss:$0 sm:$0xff]  ;;  %s582_s8 = sshll.u32 %s1043_s7, 4  ;;  %s583_s8 = int_to_ptr.hbm [resolvable:$true] %s582_s8 }
  0x1c   :  { %144 = vmatpush.bf16.msra.mxu0 %v655_v1 }
  0x1f   :  { %611 = vmatmul.msk.bf16.vlgmr.msra.gmra.mxu0 %vm133_vm0, %v654_v2 }
  0x9c   :  { %v146_v4 = vpop.f32.mrf.mxu0 }
  0x9d   :  { %v948_v5 = vadd.f32 %v683_v3, %v146_v4 }
  0x9f   :  { %v153_v6 = vmul.f32 0.70710677, %v948_v5 }
  0xa1   :  { %v155_v7 = vmul.f32 %v153_v6, %v153_v6 }
  0xa3   :  { %v156_v8 = vmin.f32 %v155_v7, 16.0 }
  0xa4   :  { %v148_v9 = vpop.f32.mrf.mxu0 }
  0xa5   :  { %v157_v10 = vmul.f32 2.1237322e-06, %v156_v8  ;;  %v951_v11 = vadd.f32 %v683_v3, %v148_v9  ;;  %v168_v12 = vmul.f32 3.8918573e-05, %v156_v8 }
  0xa7   :  { %v158_v13 = vadd.f32 0.00028619796, %v157_v10  ;;  %v954_v14 = vmul.f32 0.70710677, %v951_v11  ;;  %v169_v15 = vadd.f32 0.001143296, %v168_v12 }
  0xa9   :  { %v159_v16 = vmul.f32 %v158_v13, %v156_v8  ;;  %v195_v17 = vmul.f32 %v954_v14, %v954_v14  ;;  %v170_v18 = vmul.f32 %v169_v15, %v156_v8  ;;  %v151_v13 = vmul.f32 0.5, %v948_v5 }
  0xab   :  { %v196_v19 = vmin.f32 %v195_v17, 16.0  ;;  %v171_v20 = vadd.f32 0.014752088, %v170_v18  ;;  %v160_v21 = vadd.f32 0.0036580483, %v159_v16 }
  0xad   :  { %v197_v22 = vmul.f32 2.1237322e-06, %v196_v19  ;;  %v208_v23 = vmul.f32 3.8918573e-05, %v196_v19  ;;  %v172_v24 = vmul.f32 %v171_v20, %v156_v8  ;;  %v161_v28 = vmul.f32 %v160_v21, %v156_v8 }
  0xaf   :  { %v198_v25 = vadd.f32 0.00028619796, %v197_v22  ;;  %v209_v26 = vadd.f32 0.001143296, %v208_v23  ;;  %v173_v27 = vadd.f32 0.112945676, %v172_v24 }
  0xb0   :  { %v162_v35 = vadd.f32 0.05243302, %v161_v28  ;;  %v152_v23 = vmul.f32 0.5, %v951_v11 }
  0xb1   :  { %v199_v29 = vmul.f32 %v198_v25, %v196_v19  ;;  %v210_v30 = vmul.f32 %v209_v26, %v196_v19  ;;  %v174_v31 = vmul.f32 %v173_v27, %v156_v8  ;;  %v881_v26 = vmov 32.0  }
  0xb2   :  { %v163_v41 = vmul.f32 %v162_v35, %v156_v8 }
  0xb3   :  { %v211_v32 = vadd.f32 0.014752088, %v210_v30  ;;  %v200_v33 = vadd.f32 0.0036580483, %v199_v29  ;;  %v175_v34 = vadd.f32 0.4994258, %v174_v31 }
  0xb4   :  { %v164_v45 = vadd.f32 0.18741608, %v163_v41 }
  0xb5   :  { %v212_v36 = vmul.f32 %v211_v32, %v196_v19  ;;  %v176_v37 = vmul.f32 %v175_v34, %v156_v8  ;;  %v201_v39 = vmul.f32 %v200_v33, %v196_v19 }
  0xb6   :  { %v165_v50 = vmul.f32 %v164_v45, %v156_v8  ;;  %v646_v45 = vld [vmem:[#allocation13 + $0x38] sm:$0xf0] }
  0xb7   :  { %v213_v38 = vadd.f32 0.112945676, %v212_v36  ;;  %v177_v40 = vadd.f32 1.0, %v176_v37  ;;  %v202_v44 = vadd.f32 0.05243302, %v201_v39 }
  0xb8   :  { %v166_v55 = vadd.f32 1.1283791, %v165_v50  ;;  %v638_v50 = vld [vmem:[#allocation13 + $0x30] sm:$0xf0] }
  0xb9   :  { %v214_v42 = vmul.f32 %v213_v38, %v196_v19  ;;  %686 = vrcp.f32 %v177_v40  ;;  %v203_v49 = vmul.f32 %v202_v44, %v196_v19  ;;  %v189_v54 = vand.u32 2147483648, %v177_v40  ;;  %v663_v44 = vld [vmem:[#allocation13 + $0x2c] sm:$0xf] }
  0xba   :  { %v187_v57 = vand.u32 2147483647, %v177_v40  ;;  %vm183_vm2 = vweird.f32 %v177_v40  ;;  %v167_v63 = vmul.f32 %v166_v55, %v153_v6  ;;  %v665_v55 = vld [vmem:[#allocation13 + $0x34] sm:$0xf0] }
  0xbb   :  { %v215_v43 = vadd.f32 0.4994258, %v214_v42  ;;  %v204_v53 = vadd.f32 0.18741608, %v203_v49  ;;  %v190_v61 = vor.u32 1.1754944e-38, %v189_v54 }
  0xbc   :  { %vm188_vm4 = vcmp.eq.f32.partialorder %v187_v57, 8.507059e+37  ;;  %v662_v49 = vld [vmem:[#allocation13 + $0x24] sm:$0xf]  ;;  %v644_v54 = vld [vmem:[#allocation13 + $0x28] sm:$0xf] }
  0xbd   :  { %v216_v46 = vmul.f32 %v215_v43, %v196_v19  ;;  %v205_v60 = vmul.f32 %v204_v53, %v196_v19  ;;  %v641_v53 = vor.u32 %v662_v49, %v638_v50 }
  0xbf   :  { %v217_v47 = vadd.f32 1.0, %v216_v46  ;;  %v687_v48 = vpop.eup %686  ;;  %v206_v7 = vadd.f32 1.1283791, %v205_v60  ;;  %v636_v46 = vld [vmem:[#allocation13 + $0x20] sm:$0xf]  ;;  %401 = vmatpush.bf16.msra.mxu2 %v641_v53 }
  0xc0   :  { %v179_v51 = vmul.f32 %v687_v48, %v177_v40  ;;  %vm184_vm1 = vweird.f32 %v687_v48  ;;  %v658_v60 = vld [vmem:[#allocation13 + $0x4] sm:$0xf] }
  0xc1   :  { %688 = vrcp.f32 %v217_v47  ;;  %vm185_vm3 = vmor %vm183_vm2, %vm184_vm1  ;;  %v229_v4 = vand.u32 2147483648, %v217_v47  ;;  %v227_v9 = vand.u32 2147483647, %v217_v47  ;;  %vm223_vm6 = vweird.f32 %v217_v47 }
  0xc2   :  { %v180_v52 = vsub.f32 1.0, %v179_v51  ;;  %v207_v6 = vmul.f32 %v206_v7, %v954_v14  ;;  %690 = vrcp.f32 %v881_v26  ;;  %vm307_vm2 = vcmask 7168  }
  0xc3   :  { %v230_v16 = vor.u32 1.1754944e-38, %v229_v4  ;;  %vm228_vm8 = vcmp.eq.f32.partialorder %v227_v9, 8.507059e+37 }
  0xc4   :  { %v181_v56 = vmul.f32 %v687_v48, %v180_v52 }
  0xc6   :  { %v182_v59 = vadd.f32 %v687_v48, %v181_v56  ;;  %v620_v56 = vld [vmem:[#allocation13] sm:$0xf] }
  0xc7   :  { %v689_v58 = vpop.eup %688 }
  0xc8   :  { %v219_v62 = vmul.f32 %v689_v58, %v217_v47  ;;  %v186_v0 = vsel %vm185_vm3, %v687_v48, %v182_v59  ;;  %vm224_vm5 = vweird.f32 %v689_v58  ;;  %v691_v27 = vpop.eup %690  ;;  %v649_v47 = vor.u32 %v663_v44, %v646_v45  ;;  %v664_v48 = vld [vmem:[#allocation13 + $0x2c] sm:$0xf0] }
  0xc9   :  { %v191_v1 = vsel %vm188_vm4, %v190_v61, %v186_v0  ;;  %vm225_vm7 = vmor %vm223_vm6, %vm224_vm5  ;;  %v246_v14 = vmul.f32 32.0, %v691_v27  ;;  %vm250_vm9 = vweird.f32 %v691_v27  ;;  %v637_v52 = vor.u32 %v664_v48, %v636_v46  ;;  %v660_v59 = vld [vmem:[#allocation13 + $0xc] sm:$0xf0]  ;;  %v622_v61 = vld [vmem:[#allocation13 + $0x10] sm:$0xf0] }
  0xca   :  { %v220_v2 = vsub.f32 1.0, %v219_v62  ;;  %v192_v3 = vmul.f32 %v191_v1, %v167_v63  ;;  %429 = vmatpush.bf16.msrb.mxu0 %v649_v47  ;;  %v621_v62 = vor.u32 %v660_v59, %v620_v56  ;;  %v625_v63 = vor.u32 %v658_v60, %v622_v61  ;;  %v628_v0 = vld [vmem:[#allocation13 + $0x8] sm:$0xf]  ;;  %v661_v1 = vld [vmem:[#allocation13 + $0x14] sm:$0xf0] }
  0xcb   :  { %v247_v28 = vsub.f32 1.0, %v246_v14  ;;  %387 = vmatpush.bf16.msra.mxu1 %v637_v52  ;;  %v629_v7 = vor.u32 %v661_v1, %v628_v0  ;;  %v883_v60 = vmov 0   ;;  %v884_v61 = vmov 0.0  }
  0xcc   :  { %v221_v8 = vmul.f32 %v689_v58, %v220_v2  ;;  %v612_v10 = vclamps-f32 %v192_v3, 1.0  ;;  %v659_v2 = vld [vmem:[#allocation13 + $0xc] sm:$0xf]  ;;  %402 = vmatpush.bf16.msra.mxu2 %v625_v63  ;;  %680 = vset.pattern.permute.xlu0 %v883_v60  ;;  %310 = vst.msk [vmem:[#allocation4] sm:$0xff] %vm307_vm2, %v884_v61 }
  0xcd   :  { %v248_v29 = vmul.f32 %v691_v27, %v247_v28  ;;  %681 = vset.pattern.permute.xlu1 %v883_v60  ;;  %682 = vset.pattern.permute.xlu2 %v883_v60  ;;  %311 = vst.msk [vmem:[#allocation4 + $0x8] sm:$0xff] %vm307_vm2, %v884_v61 }
  0xce   :  { %v222_v12 = vadd.f32 %v689_v58, %v221_v8  ;;  %v235_v15 = vadd.f32 1.0, %v612_v10  ;;  %v630_v8 = vld [vmem:[#allocation13 + $0x18] sm:$0xf0] }
  0xcf   :  { %v249_v30 = vadd.f32 %v691_v27, %v248_v29  ;;  %v633_v10 = vor.u32 %v659_v2, %v630_v8  ;;  %388 = vmatpush.bf16.msra.mxu1 %v621_v62 }
  0xd0   :  { %v226_v17 = vsel %vm225_vm7, %v689_v58, %v222_v12  ;;  %v237_v18 = vmul.f32 %v235_v15, %v151_v13  ;;  %v645_v58 = vor.u32 %v665_v55, %v644_v54 }
  0xd1   :  { %v231_v19 = vsel %vm228_vm8, %v230_v16, %v226_v17  ;;  %v251_v31 = vsel %vm250_vm9, %v691_v27, %v249_v30  ;;  %430 = vmatpush.bf16.msrb.mxu0 %v633_v10 }
  0xd2   :  { %v232_v20 = vmul.f32 %v231_v19, %v207_v6  ;;  %v239_v21 = vsel %vm133_vm0, %v237_v18, 0.0  ;;  %415 = vmatpush.bf16.msra.mxu3 %v645_v58 }
  0xd3   :  { %240 = vadd.xlane.f32.xlu0 %v239_v21  ;;  %v685_v21 = vld [vmem:[#allocation11] ss:$0 sm:$0xff] }
  0xd4   :  { %v613_v22 = vclamps-f32 %v232_v20, 1.0 }
  0xd6   :  { %v236_v24 = vadd.f32 1.0, %v613_v22  ;;  %416 = vmatpush.bf16.msra.mxu3 %v629_v7 }
  0xd8   :  { %v238_v25 = vmul.f32 %v236_v24, %v152_v23 }
  0xda   :  { %v242_v5 = vsel %vm133_vm0, %v238_v25, 0.0 }
  0xdb   :  { %243 = vadd.xlane.f32.xlu0 %v242_v5 }
 0x146   :  { %v241_v32 = vpop.xlane.xlu0 %240 }
 0x147   :  { %v252_v33 = vmul.f32 %v251_v31, %v241_v32 }
 0x149   :  { %v963_v34 = vsub.f32 %v237_v18, %v252_v33  ;;  %v684_v18 = vld [vmem:[#allocation10] ss:$0 sm:$0xff]  ;;  %v882_v33 = vmov -inf  }
 0x14a   :  { %308 = vst.msk [vmem:[#allocation3] sm:$0xff] %vm307_vm2, %v882_v33 }
 0x14b   :  { %v256_v11 = vmul.f32 %v963_v34, %v963_v34  ;;  %309 = vst.msk [vmem:[#allocation3 + $0x8] sm:$0xff] %vm307_vm2, %v882_v33 }
 0x14d   :  { %v258_v35 = vsel %vm133_vm0, %v256_v11, 0.0 }
 0x14e   :  { %259 = vadd.xlane.f32.xlu1 %v258_v35  ;;  %v244_v36 = vpop.xlane.xlu0 %243 }
 0x14f   :  { %v253_v37 = vmul.f32 %v251_v31, %v244_v36 }
 0x151   :  { %v968_v38 = vsub.f32 %v238_v25, %v253_v37  ;;  %v447_v62 = vld [vmem:[#allocation3] sm:$0xff] }
 0x152   :  { %v448_v2 = vld [vmem:[#allocation3 + $0x8] sm:$0xff] }
 0x153   :  { %v257_v39 = vmul.f32 %v968_v38, %v968_v38 }
 0x155   :  { %v261_v40 = vsel %vm133_vm0, %v257_v39, 0.0 }
 0x156   :  { %262 = vadd.xlane.f32.xlu1 %v261_v40 }
 0x1c1   :  { %v260_v41 = vpop.xlane.xlu1 %259 }
 0x1c2   :  { %v264_v42 = vmul.f32 %v260_v41, %v251_v31 }
 0x1c4   :  { %v266_v43 = vadd.f32 1e-12, %v264_v42 }
 0x1c6   :  { %692 = vrsqrt.f32 %v266_v43  ;;  %vm274_vm11 = vweird.f32 %v266_v43 }
 0x1c9   :  { %v263_v51 = vpop.xlane.xlu1 %262 }
 0x1ca   :  { %v265_v57 = vmul.f32 %v263_v51, %v251_v31 }
 0x1cc   :  { %v693_v3 = vpop.eup %692  ;;  %v267_v4 = vadd.f32 1e-12, %v265_v57 }
 0x1cd   :  { %v269_v9 = vmul.f32 %v693_v3, %v266_v43  ;;  %vm275_vm10 = vweird.f32 %v693_v3 }
 0x1ce   :  { %694 = vrsqrt.f32 %v267_v4  ;;  %vm276_vm12 = vmor %vm274_vm11, %vm275_vm10  ;;  %vm284_vm15 = vweird.f32 %v267_v4 }
 0x1cf   :  { %v270_v12 = vmul.f32 %v693_v3, %v269_v9 }
 0x1d1   :  { %v271_v13 = vmul.f32 0.5, %v270_v12 }
 0x1d3   :  { %v272_v15 = vsub.f32 1.5, %v271_v13 }
 0x1d4   :  { %v695_v16 = vpop.eup %694 }
 0x1d5   :  { %v273_v6 = vmul.f32 %v693_v3, %v272_v15  ;;  %v279_v17 = vmul.f32 %v695_v16, %v267_v4  ;;  %vm285_vm13 = vweird.f32 %v695_v16 }
 0x1d6   :  { %vm286_vm1 = vmor %vm284_vm15, %vm285_vm13 }
 0x1d7   :  { %v277_v19 = vsel %vm276_vm12, %v693_v3, %v273_v6  ;;  %v280_v20 = vmul.f32 %v695_v16, %v279_v17 }
 0x1d8   :  { %v288_v22 = vmul.f32 %v277_v19, %v963_v34  ;;  %v322_v34 = vld [vmem:[%s1042_s6] sm:$0xf]  ;;  %s885_s6 = smov [#allocation14]  }
 0x1d9   :  { %v281_v23 = vmul.f32 0.5, %v280_v20  ;;  %v327_v36 = vperm.slane %v322_v34, 3  ;;  %v325_v37 = vperm.slane %v322_v34, 1  ;;  %v326_v39 = vperm.slane %v322_v34, 2  ;;  %s580_s28 = sshll.u32 %s885_s6, 4  ;;  %s581_s28 = int_to_ptr.vmem [resolvable:$true] %s580_s28 }
 0x1da   :  { %v294_v24 = vmul.f32 %v684_v18, %v288_v22 }
 0x1db   :  { %v282_v25 = vsub.f32 1.5, %v281_v23 }
 0x1dc   :  { %v300_v5 = vadd.f32 %v685_v21, %v294_v24 }
 0x1dd   :  { %v283_v26 = vmul.f32 %v695_v16, %v282_v25 }
 0x1de   :  { %v302_v27 = vpack.c.bf16 %v300_v5, %v300_v5 }
 0x1df   :  { %v287_v14 = vsel %vm286_vm1, %v695_v16, %v283_v26 }
 0x1e0   :  { %305 = vst.msk [vmem:[#allocation2] sm:$0xf] %vm304_vm14, %v302_v27  ;;  %v289_v28 = vmul.f32 %v287_v14, %v968_v38  ;;  %v324_v38 = vperm.slane %v322_v34, 0 }
 0x1e2   :  { %v295_v29 = vmul.f32 %v684_v18, %v289_v28 }
 0x1e4   :  { %v301_v30 = vadd.f32 %v685_v21, %v295_v29 }
 0x1e6   :  { %v303_v31 = vpack.c.bf16 %v301_v30, %v301_v30 }
 0x1e8   :  { %306 = vst.msk [vmem:[#allocation2 + $0x4] sm:$0xf] %vm304_vm14, %v303_v31 }
 0x1ef   :  { %v657_v32 = vld [vmem:[#allocation2] sm:$0xff] }
 0x1f0   :  { %650 = vmatmul.msk.bf16.vlgmr.msra.gmra.mxu1 %vm133_vm0, %v657_v32  ;;  %651 = vmatmul.msk.bf16.vlgmr.msra.gmra.mxu2 %vm133_vm0, %v657_v32 }
 0x1f1   :  { %652 = vmatmul.msk.bf16.vlgmr.msra.gmra.mxu3 %vm133_vm0, %v657_v32  ;;  %653 = vmatmul.msk.bf16.vlgmr.msrb.gmra.mxu0 %vm133_vm0, %v657_v32 }
 0x26d   :  { %v390_v35 = vpop.f32.mrf.mxu1 }
 0x26e   :  { %v432_v11 = vpop.f32.mrf.mxu0  ;;  %v988_v44 = vadd.f32 %v390_v35, %v324_v38 }
 0x26f   :  { %v984_v41 = vadd.f32 %v432_v11, %v327_v36 }
 0x273   :  { %v404_v40 = vpop.f32.mrf.mxu2 }
 0x274   :  { %v986_v42 = vadd.f32 %v404_v40, %v325_v37  ;;  %v418_v43 = vpop.f32.mrf.mxu3 }
 0x275   :  { %v990_v45 = vadd.f32 %v418_v43, %v326_v39  ;;  %v392_v50 = vpop.f32.mrf.mxu1  ;;  %v457_v43 = vld [vmem:[#allocation4] sm:$0xff] }
 0x276   :  { %v438_v46 = vmax.f32 %v986_v42, %v984_v41  ;;  %v434_v48 = vpop.f32.mrf.mxu0  ;;  %v1000_v55 = vadd.f32 %v392_v50, %v324_v38  ;;  %v458_v50 = vld [vmem:[#allocation4 + $0x8] sm:$0xff] }
 0x277   :  { %v437_v47 = vmax.f32 %v988_v44, %v990_v45  ;;  %v996_v52 = vadd.f32 %v434_v48, %v327_v36 }
 0x279   :  { %v439_v49 = vmax.f32 %v437_v47, %v438_v46 }
 0x27b   :  { %440 = vmax.xlane.f32.xlu2 %v439_v49  ;;  %v406_v51 = vpop.f32.mrf.mxu2 }
 0x27c   :  { %v998_v53 = vadd.f32 %v406_v51, %v325_v37  ;;  %v420_v54 = vpop.f32.mrf.mxu3 }
 0x27d   :  { %v1002_v56 = vadd.f32 %v420_v54, %v326_v39 }
 0x27e   :  { %v443_v57 = vmax.f32 %v998_v53, %v996_v52 }
 0x27f   :  { %v442_v58 = vmax.f32 %v1000_v55, %v1002_v56 }
 0x281   :  { %v444_v59 = vmax.f32 %v442_v58, %v443_v57 }
 0x283   :  { %445 = vmax.xlane.f32.xlu2 %v444_v59 }
 0x2ee   :  { %v441_v63 = vpop.xlane.xlu2 %440 }
 0x2ef   :  { %v449_v0 = vmax.f32 %v447_v62, %v441_v63 }
 0x2f1   :  { %v451_v1 = vsub.f32 %v447_v62, %v449_v0  ;;  %510 = vst.msk [vmem:[#allocation3] sm:$0xff] %vm307_vm2, %v449_v0  ;;  %463 = vperm.xlu0 %680, %v449_v0  }
 0x2f3   :  { %v453_v38 = vmul.f32 1.442695, %v451_v1 }
 0x2f6   :  { %v446_v3 = vpop.xlane.xlu2 %445 }
 0x2f7   :  { %v450_v4 = vmax.f32 %v448_v2, %v446_v3 }
 0x2f8   :  { %v528_v62 = vld [vmem:[#allocation3] sm:$0xff] }
 0x2f9   :  { %v452_v7 = vsub.f32 %v448_v2, %v450_v4  ;;  %511 = vst.msk [vmem:[#allocation3 + $0x8] sm:$0xff] %vm307_vm2, %v450_v4  ;;  %468 = vperm.xlu1 %681, %v450_v4   ;;  %v513_v4 = vpack.c.bf16 %v986_v42, %v988_v44 }
 0x2fb   :  { %v455_v39 = vmul.f32 1.442695, %v452_v7  ;;  %v514_v7 = vpack.c.bf16 %v984_v41, %v990_v45 }
 0x300   :  { %v529_v2 = vld [vmem:[#allocation3 + $0x8] sm:$0xff] }
 0x363   :  { %v464_v8 = vpop.permute.xlu0 %463 }
 0x364   :  { %v471_v9 = vsub.f32 %v988_v44, %v464_v8  ;;  %v472_v10 = vsub.f32 %v986_v42, %v464_v8  ;;  %v473_v12 = vsub.f32 %v990_v45, %v464_v8  ;;  %v474_v13 = vsub.f32 %v984_v41, %v464_v8 }
 0x365   :  { %v542_v8 = vunpack.c.l.bf16 %v513_v4  ;;  %v516_v42 = vpack.c.bf16 %v996_v52, %v1002_v56 }
 0x366   :  { %v479_v15 = vmul.f32 1.442695, %v471_v9  ;;  %v481_v16 = vmul.f32 1.442695, %v472_v10  ;;  %v483_v6 = vmul.f32 1.442695, %v473_v12  ;;  %v543_v9 = vunpack.c.h.bf16 %v513_v4 }
 0x367   :  { %v485_v17 = vmul.f32 1.442695, %v474_v13  ;;  %v544_v10 = vunpack.c.l.bf16 %v514_v7  ;;  %v545_v12 = vunpack.c.h.bf16 %v514_v7  ;;  %v548_v45 = vunpack.c.l.bf16 %v516_v42 }
 0x368   :  { %696 = vpow2.f32 %v479_v15 }
 0x369   :  { %698 = vpow2.f32 %v481_v16 }
 0x36a   :  { %700 = vpow2.f32 %v483_v6 }
 0x36b   :  { %v469_v18 = vpop.permute.xlu1 %468  ;;  %702 = vpow2.f32 %v485_v17 }
 0x36c   :  { %v475_v19 = vsub.f32 %v1000_v55, %v469_v18  ;;  %v476_v20 = vsub.f32 %v998_v53, %v469_v18  ;;  %v477_v21 = vsub.f32 %v1002_v56, %v469_v18  ;;  %v478_v22 = vsub.f32 %v996_v52, %v469_v18 }
 0x36e   :  { %v697_v23 = vpop.eup %696  ;;  %v487_v24 = vmul.f32 1.442695, %v475_v19  ;;  %v489_v25 = vmul.f32 1.442695, %v476_v20  ;;  %v491_v26 = vmul.f32 1.442695, %v477_v21  ;;  %v515_v20 = vpack.c.bf16 %v998_v53, %v1000_v55 }
 0x36f   :  { %v699_v5 = vpop.eup %698  ;;  %v493_v28 = vmul.f32 1.442695, %v478_v22  ;;  %v549_v21 = vunpack.c.h.bf16 %v516_v42 }
 0x370   :  { %704 = vpow2.f32 %v487_v24  ;;  %v495_v27 = vadd.f32 %v699_v5, %v697_v23  ;;  %v701_v14 = vpop.eup %700  ;;  %v546_v41 = vunpack.c.l.bf16 %v515_v20  ;;  %v547_v44 = vunpack.c.h.bf16 %v515_v20 }
 0x371   :  { %706 = vpow2.f32 %v489_v25  ;;  %v703_v30 = vpop.eup %702 }
 0x372   :  { %v496_v29 = vadd.f32 %v701_v14, %v495_v27  ;;  %708 = vpow2.f32 %v491_v26 }
 0x373   :  { %710 = vpow2.f32 %v493_v28 }
 0x374   :  { %v497_v31 = vadd.f32 %v703_v30, %v496_v29  ;;  %712 = vpow2.f32 %v453_v38 }
 0x375   :  { %714 = vpow2.f32 %v455_v39 }
 0x376   :  { %v705_v32 = vpop.eup %704  ;;  %498 = vadd.xlane.f32.xlu2 %v497_v31 }
 0x377   :  { %v707_v33 = vpop.eup %706 }
 0x378   :  { %v500_v34 = vadd.f32 %v707_v33, %v705_v32  ;;  %v709_v11 = vpop.eup %708 }
 0x379   :  { %v711_v36 = vpop.eup %710 }
 0x37a   :  { %v501_v35 = vadd.f32 %v709_v11, %v500_v34  ;;  %v713_v40 = vpop.eup %712 }
 0x37b   :  { %v459_v46 = vmul.f32 %v713_v40, %v457_v43  ;;  %v715_v49 = vpop.eup %714 }
 0x37c   :  { %v502_v37 = vadd.f32 %v711_v36, %v501_v35  ;;  %v460_v51 = vmul.f32 %v715_v49, %v458_v50 }
 0x37e   :  { %503 = vadd.xlane.f32.xlu2 %v502_v37 }
 0x3e9   :  { %v499_v47 = vpop.xlane.xlu2 %498 }
 0x3ea   :  { %v505_v48 = vadd.f32 %v499_v47, %v459_v46 }
 0x3ec   :  { %508 = vst.msk [vmem:[#allocation4] sm:$0xff] %vm307_vm2, %v505_v48 }
 0x3f1   :  { %v504_v54 = vpop.xlane.xlu2 %503 }
 0x3f2   :  { %v506_v57 = vadd.f32 %v504_v54, %v460_v51 }
 0x3f3   :  { %v530_v58 = vld [vmem:[#allocation4] sm:$0xff] }
 0x3f4   :  { %509 = vst.msk [vmem:[#allocation4 + $0x8] sm:$0xff] %vm307_vm2, %v506_v57  ;;  %716 = vlog2.f32 %v530_v58 }
 0x3fa   :  { %v717_v59 = vpop.eup %716 }
 0x3fb   :  { %v533_v60 = vmul.f32 0.6931472, %v717_v59  ;;  %v531_v61 = vld [vmem:[#allocation4 + $0x8] sm:$0xff] }
 0x3fc   :  { %718 = vlog2.f32 %v531_v61 }
 0x3fd   :  { %v536_v63 = vadd.f32 %v533_v60, %v528_v62 }
 0x3ff   :  { %552 = vperm.xlu2 %682, %v536_v63  }
 0x402   :  { %v719_v0 = vpop.eup %718 }
 0x403   :  { %v535_v1 = vmul.f32 0.6931472, %v719_v0 }
 0x405   :  { %v537_v3 = vadd.f32 %v535_v1, %v529_v2 }
 0x407   :  { %557 = vperm.xlu1 %681, %v537_v3  }
 0x459   :  { %v553_v13 = vpop.permute.xlu2 %552 }
 0x45a   :  { %v560_v15 = vsub.f32 %v542_v8, %v553_v13  ;;  %v561_v16 = vsub.f32 %v543_v9, %v553_v13  ;;  %v562_v6 = vsub.f32 %v544_v10, %v553_v13  ;;  %v563_v17 = vsub.f32 %v545_v12, %v553_v13 }
 0x45c   :  { %v568_v18 = vpack.c.bf16 %v561_v16, %v560_v15  ;;  %v569_v19 = vpack.c.bf16 %v563_v17, %v562_v6 }
 0x45e   :  { %572 = vst [vmem:[#allocation14] sm:$0xff] %v568_v18 }
 0x45f   :  { %573 = vst [vmem:[#allocation14 + $0x8] sm:$0xff] %v569_v19 }
 0x479   :  { %v558_v22 = vpop.permute.xlu1 %557 }
 0x47a   :  { %v564_v23 = vsub.f32 %v546_v41, %v558_v22  ;;  %v565_v24 = vsub.f32 %v547_v44, %v558_v22  ;;  %v566_v25 = vsub.f32 %v548_v45, %v558_v22  ;;  %v567_v5 = vsub.f32 %v549_v21, %v558_v22 }
 0x47c   :  { %v570_v26 = vpack.c.bf16 %v565_v24, %v564_v23  ;;  %v571_v53 = vpack.c.bf16 %v567_v5, %v566_v25 }
 0x47e   :  { %574 = vst [vmem:[#allocation14 + $0x10] sm:$0xff] %v570_v26 }
 0x47f   :  { %575 = vst [vmem:[#allocation14 + $0x18] sm:$0xff] %v571_v53 }
 0x480   :  { %588 = dma.vmem_to_hbm [thread:$0]  %s581_s28, 512, %s583_s8, [#allocation7], %s879_s25, %s879_s25, %s880_s26  }
 0x481   :  { %870 = dma.done.wait [#allocation7], 512  }
 0x482   :  { %871 = vsyncadd [#allocation7], 4294966784 }
 0x483   :  { %593 = vsyncpa [#allocation6], 1 }
 0x484   :  { %594 = vsyncpa [#allocation9], 1 }
 0x485   :  { %595 = vsyncpa [#allocation12], 1 }
 0x486   :  { %596 = vsyncpa [#allocation7], 1 }

</bundles_post_ra>
